<compile_context>
chip_gen: v6e
topology: v6e:2x2x1
jax: 0.10.0
libtpu: 0.0.40
codegen_flags: <defaults>
</compile_context>

<pallas_src>
import jax
import jax.numpy as jnp
from jax.experimental import pallas as pl
from jax.experimental.pallas import tpu as pltpu


def _mlp_kernel(x_ref,
                w1_ref, b1_ref,
                w2_ref, b2_ref,
                w3_ref, b3_ref,
                w4_ref, b4_ref,
                w5_ref, b5_ref,
                o_ref):
    """One batch tile of the 5-layer MLP.

    Weights are VMEM-resident bf16; accumulation / bias / ReLU in f32.
    Output is written as a lane-dense (1, 1, TB) row.
    """
    # In-kernel f32 -> bf16 cast of the activations (saves a wrapper-side
    # HBM read+write of x).
    h = x_ref[...].astype(jnp.bfloat16)                               # (TB, 81)

    # Layer 1: (TB, 81) @ (81, 256) -> f32 acc, +bias, ReLU
    h = jnp.dot(h, w1_ref[...], preferred_element_type=jnp.float32) + b1_ref[...]
    h = jnp.maximum(h, 0.0).astype(jnp.bfloat16)                      # (TB, 256)

    # Layer 2: (TB, 256) @ (256, 128)
    h = jnp.dot(h, w2_ref[...], preferred_element_type=jnp.float32) + b2_ref[...]
    h = jnp.maximum(h, 0.0).astype(jnp.bfloat16)                      # (TB, 128)

    # Layer 3: (TB, 128) @ (128, 64)
    h = jnp.dot(h, w3_ref[...], preferred_element_type=jnp.float32) + b3_ref[...]
    h = jnp.maximum(h, 0.0).astype(jnp.bfloat16)                      # (TB, 64)

    # Layer 4: (TB, 64) @ (64, 32)
    h = jnp.dot(h, w4_ref[...], preferred_element_type=jnp.float32) + b4_ref[...]
    h = jnp.maximum(h, 0.0).astype(jnp.bfloat16)                      # (TB, 32)

    # Layer 5 (N=1): produce a lane-dense (1, TB) row directly with an
    # A @ B^T matmul (contraction on the last dims of both operands), so the
    # output store is an unmasked full-lane store instead of TB masked
    # single-lane stores.
    out_row = jax.lax.dot_general(
        w5_ref[...], h,
        dimension_numbers=(((1,), (1,)), ((), ())),
        preferred_element_type=jnp.float32) + b5_ref[...]             # (1, TB)

    o_ref[...] = out_row.reshape(o_ref.shape).astype(o_ref.dtype)


def _round_up(n, m):
    return ((n + m - 1) // m) * m


def _choose_tb(B):
    """Pick the batch tile size.

    Small/medium batch: one tile rounded to 16 rows (bf16 sublane packing),
    zero wasted grid steps and negligible pad.
    Large batch: MXU-pass-aligned tile (multiple of 256) with >= 4 grid steps
    when possible so both v7x TensorCores get work and can pipeline; capped at
    2048 so f32 intermediates stay ~2 MB (fits default scoped VMEM everywhere).
    """
    if B <= 512:
        return max(16, _round_up(B, 16))
    for tb in (2048, 1024, 512, 256):
        if B // tb >= 4:
            return tb
    return 256


@jax.jit
def prediction_model_forward(x, params):
    """x: (B, 81) float32; params: dict of pre-transposed weights / biases.

    Returns (B, 1) float32.
    """
    B = x.shape[0]
    TB = _choose_tb(B)
    B_pad = _round_up(B, TB)
    if B_pad != B:
        x = jnp.pad(x, ((0, B_pad - B), (0, 0)))
    num_tiles = B_pad // TB

    # bf16 matmul operands (tiny, cast once per call); biases stay f32.
    w1 = params["w1"].astype(jnp.bfloat16)
    w2 = params["w2"].astype(jnp.bfloat16)
    w3 = params["w3"].astype(jnp.bfloat16)
    w4 = params["w4"].astype(jnp.bfloat16)
    w5 = params["w5"].reshape(1, 32).astype(jnp.bfloat16)   # (32,1) -> (1,32)
    b1, b2, b3, b4, b5 = (params["b1"], params["b2"], params["b3"],
                          params["b4"], params["b5"])

    def const_spec(arr):
        # Full-array block, same block index every grid step -> fetched once,
        # stays VMEM-resident across the whole grid.
        return pl.BlockSpec(arr.shape, lambda i: (0,) * arr.ndim)

    consts = (w1, b1, w2, b2, w3, b3, w4, b4, w5, b5)
    in_specs = [pl.BlockSpec((TB, 81), lambda i: (i, 0))] + \
               [const_spec(a) for a in consts]

    out_pad = pl.pallas_call(
        _mlp_kernel,
        out_shape=jax.ShapeDtypeStruct((num_tiles, 1, TB), jnp.float32),
        grid=(num_tiles,),
        in_specs=in_specs,
        out_specs=pl.BlockSpec((1, 1, TB), lambda i: (i, 0, 0)),
        compiler_params=pltpu.CompilerParams(
            dimension_semantics=("parallel",)),
    )(x, *consts)

    # (num_tiles, 1, TB) row-major == batch order -> (B_pad, 1), drop pad rows.
    return out_pad.reshape(B_pad, 1)[:B]


def init_params(key):
    """Deterministic init matching PyTorch nn.Linear default (U(-k, k), k=1/sqrt(fan_in)).

    Weights are stored pre-transposed as (in_features, out_features);
    biases as (1, out_features) for clean 2-D broadcasting in the kernel.
    """
    dims = [(81, 256), (256, 128), (128, 64), (64, 32), (32, 1)]
    params = {}
    for idx, (fan_in, fan_out) in enumerate(dims, start=1):
        key, kw, kb = jax.random.split(key, 3)
        bound = 1.0 / (fan_in ** 0.5)
        params[f"w{idx}"] = jax.random.uniform(
            kw, (fan_in, fan_out), jnp.float32, minval=-bound, maxval=bound)
        params[f"b{idx}"] = jax.random.uniform(
            kb, (1, fan_out), jnp.float32, minval=-bound, maxval=bound)
    return params


def _reference_forward(x, params):
    """Pure-JAX reference mirroring the kernel's bf16-operand / f32-accum math."""
    h = x.astype(jnp.bfloat16)
    for i in range(1, 5):
        h = jnp.dot(h, params[f"w{i}"].astype(jnp.bfloat16),
                    preferred_element_type=jnp.float32) + params[f"b{i}"]
        h = jnp.maximum(h, 0.0).astype(jnp.bfloat16)
    return jnp.dot(h, params["w5"].astype(jnp.bfloat16),
                   preferred_element_type=jnp.float32) + params["b5"]


if __name__ == "__main__":
    key = jax.random.PRNGKey(0)
    key, kx = jax.random.split(key)

    B = 8  # small batch for the test path (one (16, 81) tile after rounding)
    x = jax.random.normal(kx, (B, 81), dtype=jnp.float32)

    params = init_params(key)

    out = jax.block_until_ready(prediction_model_forward(x, params))

    ref = _reference_forward(x, params)
    assert out.shape == (B, 1), out.shape
    assert jnp.allclose(out, ref, atol=1e-3, rtol=1e-3), "mismatch vs reference"

    print("KERNEL_OK")
</pallas_src>

<mosaic_0001>
module attributes {stable_mosaic.version = 11 : i64} {
  func.func @_mlp_kernel(%arg0: i32, %arg1: memref<16x81xf32, #tpu.memory_space<vmem>>, %arg2: memref<81x256xbf16, #tpu.memory_space<vmem>>, %arg3: memref<1x256xf32, #tpu.memory_space<vmem>>, %arg4: memref<256x128xbf16, #tpu.memory_space<vmem>>, %arg5: memref<1x128xf32, #tpu.memory_space<vmem>>, %arg6: memref<128x64xbf16, #tpu.memory_space<vmem>>, %arg7: memref<1x64xf32, #tpu.memory_space<vmem>>, %arg8: memref<64x32xbf16, #tpu.memory_space<vmem>>, %arg9: memref<1x32xf32, #tpu.memory_space<vmem>>, %arg10: memref<1x32xbf16, #tpu.memory_space<vmem>>, %arg11: memref<1x1xf32, #tpu.memory_space<vmem>>, %arg12: memref<1x1x16xf32, #tpu.memory_space<vmem>>) attributes {dimension_semantics = [#tpu.dimension_semantics<parallel>], iteration_bounds = array<i64: 1>, scalar_prefetch = 0 : i64, scratch_operands = 0 : i64, tpu.core_type = #tpu.core_type<tc>, window_params = [{transform_indices = @transform_0, window_bounds = array<i64: 16, 81>}, {pipeline_mode = #tpu.pipeline_mode<synchronous>, transform_indices = @transform_1, window_bounds = array<i64: 81, 256>}, {pipeline_mode = #tpu.pipeline_mode<synchronous>, transform_indices = @transform_2, window_bounds = array<i64: 1, 256>}, {pipeline_mode = #tpu.pipeline_mode<synchronous>, transform_indices = @transform_3, window_bounds = array<i64: 256, 128>}, {pipeline_mode = #tpu.pipeline_mode<synchronous>, transform_indices = @transform_4, window_bounds = array<i64: 1, 128>}, {pipeline_mode = #tpu.pipeline_mode<synchronous>, transform_indices = @transform_5, window_bounds = array<i64: 128, 64>}, {pipeline_mode = #tpu.pipeline_mode<synchronous>, transform_indices = @transform_6, window_bounds = array<i64: 1, 64>}, {pipeline_mode = #tpu.pipeline_mode<synchronous>, transform_indices = @transform_7, window_bounds = array<i64: 64, 32>}, {pipeline_mode = #tpu.pipeline_mode<synchronous>, transform_indices = @transform_8, window_bounds = array<i64: 1, 32>}, {pipeline_mode = #tpu.pipeline_mode<synchronous>, transform_indices = @transform_9, window_bounds = array<i64: 1, 32>}, {pipeline_mode = #tpu.pipeline_mode<synchronous>, transform_indices = @transform_10, window_bounds = array<i64: 1, 1>}, {transform_indices = @transform_11, window_bounds = array<i64: 1, 1, 16>}]} {
    %c0 = arith.constant 0 : index
    %c0_0 = arith.constant 0 : index
    %0 = vector.load %arg1[%c0, %c0_0] : memref<16x81xf32, #tpu.memory_space<vmem>>, vector<16x81xf32>
    %1 = arith.truncf %0 : vector<16x81xf32> to vector<16x81xbf16>
    %c0_1 = arith.constant 0 : index
    %c0_2 = arith.constant 0 : index
    %2 = vector.load %arg2[%c0_1, %c0_2] : memref<81x256xbf16, #tpu.memory_space<vmem>>, vector<81x256xbf16>
    %cst = arith.constant dense<0.000000e+00> : vector<16x256xf32>
    %3 = tpu.matmul %1, %2, %cst {dimension_numbers = #tpu.dot_dimension_numbers<[1], [0], [0], [1], [0, 0, 1, 1], [], []>} : vector<16x81xbf16>, vector<81x256xbf16>, vector<16x256xf32> -> vector<16x256xf32>
    %c0_3 = arith.constant 0 : index
    %c0_4 = arith.constant 0 : index
    %4 = vector.load %arg3[%c0_3, %c0_4] : memref<1x256xf32, #tpu.memory_space<vmem>>, vector<1x256xf32>
    %5 = vector.broadcast %4 : vector<1x256xf32> to vector<16x256xf32>
    %6 = arith.addf %3, %5 : vector<16x256xf32>
    %cst_5 = arith.constant 0.000000e+00 : f32
    %7 = vector.broadcast %cst_5 : f32 to vector<16x256xf32>
    %8 = arith.maximumf %6, %7 : vector<16x256xf32>
    %9 = arith.truncf %8 : vector<16x256xf32> to vector<16x256xbf16>
    %c0_6 = arith.constant 0 : index
    %c0_7 = arith.constant 0 : index
    %10 = vector.load %arg4[%c0_6, %c0_7] : memref<256x128xbf16, #tpu.memory_space<vmem>>, vector<256x128xbf16>
    %cst_8 = arith.constant dense<0.000000e+00> : vector<16x128xf32>
    %11 = tpu.matmul %9, %10, %cst_8 {dimension_numbers = #tpu.dot_dimension_numbers<[1], [0], [0], [1], [0, 0, 1, 1], [], []>} : vector<16x256xbf16>, vector<256x128xbf16>, vector<16x128xf32> -> vector<16x128xf32>
    %c0_9 = arith.constant 0 : index
    %c0_10 = arith.constant 0 : index
    %12 = vector.load %arg5[%c0_9, %c0_10] : memref<1x128xf32, #tpu.memory_space<vmem>>, vector<1x128xf32>
    %13 = vector.broadcast %12 : vector<1x128xf32> to vector<16x128xf32>
    %14 = arith.addf %11, %13 : vector<16x128xf32>
    %cst_11 = arith.constant 0.000000e+00 : f32
    %15 = vector.broadcast %cst_11 : f32 to vector<16x128xf32>
    %16 = arith.maximumf %14, %15 : vector<16x128xf32>
    %17 = arith.truncf %16 : vector<16x128xf32> to vector<16x128xbf16>
    %c0_12 = arith.constant 0 : index
    %c0_13 = arith.constant 0 : index
    %18 = vector.load %arg6[%c0_12, %c0_13] : memref<128x64xbf16, #tpu.memory_space<vmem>>, vector<128x64xbf16>
    %cst_14 = arith.constant dense<0.000000e+00> : vector<16x64xf32>
    %19 = tpu.matmul %17, %18, %cst_14 {dimension_numbers = #tpu.dot_dimension_numbers<[1], [0], [0], [1], [0, 0, 1, 1], [], []>} : vector<16x128xbf16>, vector<128x64xbf16>, vector<16x64xf32> -> vector<16x64xf32>
    %c0_15 = arith.constant 0 : index
    %c0_16 = arith.constant 0 : index
    %20 = vector.load %arg7[%c0_15, %c0_16] : memref<1x64xf32, #tpu.memory_space<vmem>>, vector<1x64xf32>
    %21 = vector.broadcast %20 : vector<1x64xf32> to vector<16x64xf32>
    %22 = arith.addf %19, %21 : vector<16x64xf32>
    %cst_17 = arith.constant 0.000000e+00 : f32
    %23 = vector.broadcast %cst_17 : f32 to vector<16x64xf32>
    %24 = arith.maximumf %22, %23 : vector<16x64xf32>
    %25 = arith.truncf %24 : vector<16x64xf32> to vector<16x64xbf16>
    %c0_18 = arith.constant 0 : index
    %c0_19 = arith.constant 0 : index
    %26 = vector.load %arg8[%c0_18, %c0_19] : memref<64x32xbf16, #tpu.memory_space<vmem>>, vector<64x32xbf16>
    %cst_20 = arith.constant dense<0.000000e+00> : vector<16x32xf32>
    %27 = tpu.matmul %25, %26, %cst_20 {dimension_numbers = #tpu.dot_dimension_numbers<[1], [0], [0], [1], [0, 0, 1, 1], [], []>} : vector<16x64xbf16>, vector<64x32xbf16>, vector<16x32xf32> -> vector<16x32xf32>
    %c0_21 = arith.constant 0 : index
    %c0_22 = arith.constant 0 : index
    %28 = vector.load %arg9[%c0_21, %c0_22] : memref<1x32xf32, #tpu.memory_space<vmem>>, vector<1x32xf32>
    %29 = vector.broadcast %28 : vector<1x32xf32> to vector<16x32xf32>
    %30 = arith.addf %27, %29 : vector<16x32xf32>
    %cst_23 = arith.constant 0.000000e+00 : f32
    %31 = vector.broadcast %cst_23 : f32 to vector<16x32xf32>
    %32 = arith.maximumf %30, %31 : vector<16x32xf32>
    %33 = arith.truncf %32 : vector<16x32xf32> to vector<16x32xbf16>
    %c0_24 = arith.constant 0 : index
    %c0_25 = arith.constant 0 : index
    %34 = vector.load %arg10[%c0_24, %c0_25] : memref<1x32xbf16, #tpu.memory_space<vmem>>, vector<1x32xbf16>
    %cst_26 = arith.constant dense<0.000000e+00> : vector<1x16xf32>
    %35 = tpu.matmul %34, %33, %cst_26 {dimension_numbers = #tpu.dot_dimension_numbers<[1], [1], [0], [0], [0, 0, 1, 0], [], []>} : vector<1x32xbf16>, vector<16x32xbf16>, vector<1x16xf32> -> vector<1x16xf32>
    %c0_27 = arith.constant 0 : index
    %c0_28 = arith.constant 0 : index
    %36 = vector.load %arg11[%c0_27, %c0_28] : memref<1x1xf32, #tpu.memory_space<vmem>>, vector<1x1xf32>
    %37 = vector.broadcast %36 : vector<1x1xf32> to vector<1x16xf32>
    %38 = arith.addf %35, %37 : vector<1x16xf32>
    %39 = vector.shape_cast %38 : vector<1x16xf32> to vector<1x1x16xf32>
    %c0_29 = arith.constant 0 : index
    %c0_30 = arith.constant 0 : index
    %c0_31 = arith.constant 0 : index
    %40 = vector.load %arg12[%c0_29, %c0_30, %c0_31] : memref<1x1x16xf32, #tpu.memory_space<vmem>>, vector<1x1x16xf32>
    tpu.vector_store %arg12[%c0_29, %c0_30, %c0_31], %39 {strides = array<i32>} : memref<1x1x16xf32, #tpu.memory_space<vmem>>, vector<1x1x16xf32>,
    return
  }
  func.func @transform_0(%arg0: i32) -> (i32, i32) {
    %c0_i32 = arith.constant 0 : i32
    %c0_i32_0 = arith.constant 0 : i32
    return %arg0, %c0_i32 : i32, i32
  }
  func.func @transform_1(%arg0: i32) -> (i32, i32) {
    %c0_i32 = arith.constant 0 : i32
    %c0_i32_0 = arith.constant 0 : i32
    %c0_i32_1 = arith.constant 0 : i32
    return %c0_i32, %c0_i32_0 : i32, i32
  }
  func.func @transform_2(%arg0: i32) -> (i32, i32) {
    %c0_i32 = arith.constant 0 : i32
    %c0_i32_0 = arith.constant 0 : i32
    %c0_i32_1 = arith.constant 0 : i32
    return %c0_i32, %c0_i32_0 : i32, i32
  }
  func.func @transform_3(%arg0: i32) -> (i32, i32) {
    %c0_i32 = arith.constant 0 : i32
    %c0_i32_0 = arith.constant 0 : i32
    %c0_i32_1 = arith.constant 0 : i32
    return %c0_i32, %c0_i32_0 : i32, i32
  }
  func.func @transform_4(%arg0: i32) -> (i32, i32) {
    %c0_i32 = arith.constant 0 : i32
    %c0_i32_0 = arith.constant 0 : i32
    %c0_i32_1 = arith.constant 0 : i32
    return %c0_i32, %c0_i32_0 : i32, i32
  }
  func.func @transform_5(%arg0: i32) -> (i32, i32) {
    %c0_i32 = arith.constant 0 : i32
    %c0_i32_0 = arith.constant 0 : i32
    %c0_i32_1 = arith.constant 0 : i32
    return %c0_i32, %c0_i32_0 : i32, i32
  }
  func.func @transform_6(%arg0: i32) -> (i32, i32) {
    %c0_i32 = arith.constant 0 : i32
    %c0_i32_0 = arith.constant 0 : i32
    %c0_i32_1 = arith.constant 0 : i32
    return %c0_i32, %c0_i32_0 : i32, i32
  }
  func.func @transform_7(%arg0: i32) -> (i32, i32) {
    %c0_i32 = arith.constant 0 : i32
    %c0_i32_0 = arith.constant 0 : i32
    %c0_i32_1 = arith.constant 0 : i32
    return %c0_i32, %c0_i32_0 : i32, i32
  }
  func.func @transform_8(%arg0: i32) -> (i32, i32) {
    %c0_i32 = arith.constant 0 : i32
    %c0_i32_0 = arith.constant 0 : i32
    %c0_i32_1 = arith.constant 0 : i32
    return %c0_i32, %c0_i32_0 : i32, i32
  }
  func.func @transform_9(%arg0: i32) -> (i32, i32) {
    %c0_i32 = arith.constant 0 : i32
    %c0_i32_0 = arith.constant 0 : i32
    %c0_i32_1 = arith.constant 0 : i32
    return %c0_i32, %c0_i32_0 : i32, i32
  }
  func.func @transform_10(%arg0: i32) -> (i32, i32) {
    %c0_i32 = arith.constant 0 : i32
    %c0_i32_0 = arith.constant 0 : i32
    %c0_i32_1 = arith.constant 0 : i32
    return %c0_i32, %c0_i32_0 : i32, i32
  }
  func.func @transform_11(%arg0: i32) -> (i32, i32, i32) {
    %c0_i32 = arith.constant 0 : i32
    %c0_i32_0 = arith.constant 0 : i32
    %c0_i32_1 = arith.constant 0 : i32
    return %arg0, %c0_i32, %c0_i32_0 : i32, i32, i32
  }
}

</mosaic_0001>

<bundles_post_ra>
// kernel: prediction_model_forward.1
= control target key start
LH: loop header
LB: loop body
LE: loop exit
PB: predicated region body
PF: predicated region fallthrough
CT: control target
= control target key end

     0   :  { %vm126_vm0 = vcmask 1040384   ;;  %v800_v1 = vmov 0   ;;  %vm122_vm1 = vcmask 662528   ;;  %v801_v36 = vmov 0.0   ;;  %s1034_s1 = inlined_call_operand.vmem [shape: bf16[81,256], index: 1, kind: input, shape index: {}]   ;;  %s1035_s3 = inlined_call_operand.vmem [shape: bf16[256,128], index: 3, kind: input, shape index: {}]   ;;  %s1036_s0 = inlined_call_operand.vmem [shape: f32[16,81], index: 0, kind: input, shape index: {}]   ;;  %s1037_s5 = inlined_call_operand.vmem [shape: bf16[128,64], index: 5, kind: input, shape index: {}]   ;;  %s1038_s2 = inlined_call_operand.vmem [shape: f32[1,256], index: 2, kind: input, shape index: {}]   ;;  %s1039_s7 = inlined_call_operand.vmem [shape: bf16[64,32], index: 7, kind: input, shape index: {}]   ;;  %s1040_s4 = inlined_call_operand.vmem [shape: f32[1,128], index: 4, kind: input, shape index: {}]   ;;  %s1041_s6 = inlined_call_operand.vmem [shape: f32[1,64], index: 6, kind: input, shape index: {}]   ;;  %s1042_s10 = inlined_call_operand.<no memory space> [shape: f32[1,1], index: 10, kind: input, shape index: {}]   ;;  %s1043_s8 = inlined_call_operand.vmem [shape: f32[1,32], index: 8, kind: input, shape index: {}]   ;;  %s1044_s9 = inlined_call_operand.vmem [shape: bf16[1,32], index: 9, kind: input, shape index: {}]   ;;  %s1045_s11 = inlined_call_operand.vmem [shape: f32[1,1,16], index: 11, kind: output, shape index: {}]  }
   0x1   :  { %v54_v0 = vld [vmem:[%s1034_s1 + $0x50] sm:$0x11]  ;;  %v128_v2 = vsel %vm126_vm0, 65535, %v800_v1  ;;  %167 = vmatprep.mubr.bf16.mxu0 %v800_v1  ;;  %754 = vset.pattern.permute.xlu0 %v800_v1  ;;  %v757_v7 = vld [vmem:[%s1034_s1 + $0x44] ss:$8 sps:$4 sm:$0xff]   ;;  %v772_v11 = vld [vmem:[%s1035_s3 + $0x78] sm:$0xff]   ;;  %v57_v41 = vlaneseq }
   0x2   :  { %v640_v3 = vcombine.high %v54_v0, %v54_v0  ;;  %v639_v4 = vcombine.low %v54_v0, %v54_v0  ;;  %v759_v8 = vld [vmem:[%s1034_s1 + $0x40] ss:$8 sps:$4 sm:$0xff]   ;;  %v760_v9 = vld [vmem:[%s1034_s1 + $0x34] ss:$8 sps:$4 sm:$0xff]   ;;  %v762_v10 = vld [vmem:[%s1034_s1 + $0x30] ss:$8 sps:$4 sm:$0xff]   ;;  %675 = vmatprep.subr.bf16.mxu1 %v772_v11 }
   0x3   :  { %v763_v12 = vld [vmem:[%s1034_s1 + $0x24] ss:$8 sps:$4 sm:$0xff]   ;;  %v773_v13 = vld [vmem:[%s1035_s3 + $0x38] sm:$0xff]   ;;  %v774_v14 = vld [vmem:[%s1035_s3 + $0x70] sm:$0xff]   ;;  %v968_v42 = vshrl.u32 %v57_v41, 7  ;;  %vm802_vm2 = vmmov 0  }
   0x4   :  { %v133_v5 = vand.u32 %v640_v3, %v128_v2  ;;  %v130_v6 = vand.u32 %v639_v4, %v128_v2  ;;  %676 = vmatpush3.bf16.msra.mxu1 %v773_v13  ;;  %v775_v15 = vld [vmem:[%s1035_s3 + $0x30] sm:$0xff]   ;;  %v776_v16 = vld [vmem:[%s1035_s3 + $0x68] sm:$0xff]   ;;  %v778_v21 = vld [vmem:[%s1035_s3 + $0x60] sm:$0xff]   ;;  %vm517_vm3 = vcmask 523264   ;;  %vm576_vm4 = vcmask 261120  }
   0x5   :  { %677 = vmatprep.subr.bf16.mxu1 %v774_v14  ;;  %v765_v17 = vld [vmem:[%s1034_s1 + $0x20] ss:$8 sps:$4 sm:$0xff]   ;;  %v766_v18 = vld [vmem:[%s1034_s1 + $0x14] ss:$8 sps:$4 sm:$0xff]   ;;  %v768_v20 = vld [vmem:[%s1034_s1 + $0x10] ss:$8 sps:$4 sm:$0xff]  }
   0x6   :  { %139 = vmatprep.subr.bf16.mxu0 %v133_v5  ;;  %v777_v19 = vld [vmem:[%s1035_s3 + $0x28] sm:$0xff]   ;;  %v779_v23 = vld [vmem:[%s1035_s3 + $0x20] sm:$0xff]   ;;  %v780_v24 = vld [vmem:[%s1035_s3 + $0x58] sm:$0xff]   ;;  %v63_v43 = vsub.s32 1, %v968_v42  ;;  %v59_v44 = vsub.s32 0, %v968_v42  ;;  %vm623_vm5 = vcmask 122880  }
   0x7   :  { %140 = vmatpush1.bf16.msra.mxu0 %v130_v6  ;;  %v769_v22 = vld [vmem:[%s1034_s1 + $0x4] ss:$8 sps:$4 sm:$0xff]   ;;  %v771_v25 = vld [vmem:[%s1034_s1] ss:$8 sps:$4 sm:$0xff]   ;;  %v781_v28 = vld [vmem:[%s1035_s3 + $0x18] sm:$0xff]  }
   0x8   :  { %141 = vmatprep.subr.bf16.mxu0 %v757_v7  ;;  %678 = vmatpush3.bf16.msra.mxu1 %v775_v15  ;;  %v41_v26 = vld [vmem:[%s1036_s0] sm:$0xff]  ;;  %v42_v27 = vld [vmem:[%s1036_s0 + $0x8] sm:$0xff]  ;;  %v782_v30 = vld [vmem:[%s1035_s3 + $0x50] sm:$0xff]  }
   0x9   :  { %679 = vmatprep.subr.bf16.mxu1 %v776_v16  ;;  %v43_v29 = vpack.c.bf16 %v42_v27, %v41_v26  ;;  %v783_v31 = vld [vmem:[%s1035_s3 + $0x10] sm:$0xff]   ;;  %v784_v32 = vld [vmem:[%s1035_s3 + $0x48] sm:$0xff]   ;;  %v786_v34 = vld [vmem:[%s1035_s3 + $0x40] sm:$0xff]  }
   0xa   :  { %v785_v33 = vld [vmem:[%s1035_s3 + $0x8] sm:$0xff]   ;;  %v787_v35 = vld [vmem:[%s1035_s3] sm:$0xff]   ;;  %v788_v37 = vld [vmem:[%s1037_s5 + $0x38] sm:$0xff]  }
   0xb   :  { %142 = vmatpush1.bf16.msra.mxu0 %v759_v8  ;;  %v789_v38 = vld [vmem:[%s1037_s5 + $0x30] sm:$0xff]   ;;  %v790_v39 = vld [vmem:[%s1037_s5 + $0x28] sm:$0xff]   ;;  %v791_v40 = vld [vmem:[%s1037_s5 + $0x20] sm:$0xff]  }
   0xc   :  { %143 = vmatprep.subr.bf16.mxu0 %v760_v9  ;;  %680 = vmatpush3.bf16.msra.mxu1 %v777_v19  ;;  %v55_v45 = vld [vmem:[%s1038_s2] sm:$0x3]  ;;  %v792_v62 = vld [vmem:[%s1037_s5 + $0x18] sm:$0xff]   ;;  %v793_v63 = vld [vmem:[%s1037_s5 + $0x10] sm:$0xff]  }
   0xd   :  { %681 = vmatprep.subr.bf16.mxu1 %v778_v21  ;;  %v64_v47 = vrot.slane %v55_v45, %v63_v43  ;;  %v60_v48 = vrot.slane %v55_v45, %v59_v44  ;;  %v794_v0 = vld [vmem:[%s1037_s5 + $0x8] sm:$0xff]   ;;  %v795_v1 = vld [vmem:[%s1037_s5] sm:$0xff]   ;;  %v796_v2 = vld [vmem:[%s1039_s7 + $0x18] sm:$0xff]  }
   0xe   :  { %v642_v6 = vld [vmem:[%s1040_s4] ss:$0 sm:$0xff]  ;;  %v797_v15 = vld [vmem:[%s1039_s7 + $0x10] sm:$0xff]   ;;  %v798_v16 = vld [vmem:[%s1039_s7 + $0x8] sm:$0xff]  }
   0xf   :  { %144 = vmatpush1.bf16.msra.mxu0 %v762_v10  ;;  %v565_v41 = vld [vmem:[%s1044_s9] sm:$0x1] }
  0x10   :  { %145 = vmatprep.subr.bf16.mxu0 %v763_v12  ;;  %682 = vmatpush3.bf16.msra.mxu1 %v779_v23 }
  0x11   :  { %683 = vmatprep.subr.bf16.mxu1 %v780_v24 }
  0x13   :  { %146 = vmatpush1.bf16.msra.mxu0 %v765_v17  ;;  %v799_v17 = vld [vmem:[%s1039_s7] sm:$0xff]  }
  0x14   :  { %147 = vmatprep.subr.bf16.mxu0 %v766_v18  ;;  %684 = vmatpush3.bf16.msra.mxu1 %v781_v28  ;;  %v659_v18 = vld [vmem:[%s1041_s6] ss:$0 sm:$0xff]  ;;  %v16_v28 = vstv %s1042_s10 }
  0x15   :  { %685 = vmatprep.subr.bf16.mxu1 %v782_v30  ;;  %17 = vst [vmem:[#allocation2] sm:$0x1] %v16_v28  ;;  %v668_v30 = vld [vmem:[%s1043_s8] ss:$0 sm:$0xff] }
  0x17   :  { %148 = vmatpush1.bf16.msra.mxu0 %v768_v20 }
  0x18   :  { %149 = vmatprep.subr.bf16.mxu0 %v769_v22  ;;  %686 = vmatpush3.bf16.msra.mxu1 %v783_v31 }
  0x19   :  { %687 = vmatprep.subr.bf16.mxu1 %v784_v32 }
  0x1b   :  { %150 = vmatpush1.bf16.msra.mxu0 %v771_v25 }
  0x1c   :  { %688 = vmatpush3.bf16.msra.mxu1 %v785_v33  ;;  %713 = vmatprep.subr.bf16.mxu0 %v801_v36 }
  0x1d   :  { %689 = vmatprep.subr.bf16.mxu1 %v786_v34 }
  0x1e   :  { %641 = vmatmul.mubr.msk.bf16.vlgmr.msra.gmra.mxu0 %vm122_vm1, %v43_v29  ;;  %v566_v29 = vld [vmem:[#allocation2] sm:$0x1] }
  0x1f   :  { %714 = vmatpush3.bf16.msra.mxu0 %v788_v37  ;;  %729 = vmatprep.mubr.msk.bf16.mxu0 %vm802_vm2, %v801_v36 }
  0x20   :  { %690 = vmatpush3.bf16.msra.mxu1 %v787_v35  ;;  %715 = vmatprep.subr.bf16.mxu0 %v801_v36 }
  0x21   :  { %733 = vmatprep.subr.bf16.mxu1 %v801_v36  ;;  %569 = vperm.xlu0 %754, %v566_v29  }
  0x23   :  { %716 = vmatpush3.bf16.msra.mxu0 %v789_v38 }
  0x24   :  { %717 = vmatprep.subr.bf16.mxu0 %v801_v36 }
  0x27   :  { %718 = vmatpush3.bf16.msra.mxu0 %v790_v39 }
  0x28   :  { %719 = vmatprep.subr.bf16.mxu0 %v801_v36 }
  0x2b   :  { %720 = vmatpush3.bf16.msra.mxu0 %v791_v40 }
  0x2c   :  { %721 = vmatprep.subr.bf16.mxu0 %v801_v36 }
  0x2f   :  { %722 = vmatpush3.bf16.msra.mxu0 %v792_v62 }
  0x30   :  { %723 = vmatprep.subr.bf16.mxu0 %v801_v36 }
  0x33   :  { %724 = vmatpush3.bf16.msra.mxu0 %v793_v63 }
  0x34   :  { %725 = vmatprep.subr.bf16.mxu0 %v801_v36 }
  0x37   :  { %726 = vmatpush3.bf16.msra.mxu0 %v794_v0 }
  0x38   :  { %727 = vmatprep.subr.bf16.mxu0 %v801_v36 }
  0x3b   :  { %728 = vmatpush3.bf16.msra.mxu0 %v795_v1 }
  0x9c   :  { %v570_v43 = vpop.permute.xlu0 %569 }
  0x9d   :  { %v575_v45 = vrot.slane %v570_v43, %v59_v44 }
  0xde   :  { %v169_v46 = vpop.f32.mrf.mxu0 }
  0xdf   :  { %v170_v53 = vadd.f32 %v169_v46, %v60_v48 }
  0xe0   :  { %v171_v49 = vpop.f32.mrf.mxu0 }
  0xe1   :  { %v172_v51 = vadd.f32 %v171_v49, %v64_v47  ;;  %v178_v59 = vmax.f32 %v170_v53, 0.0 }
  0xe2   :  { %v173_v50 = vpop.f32.mrf.mxu0 }
  0xe3   :  { %v174_v52 = vadd.f32 %v173_v50, %v60_v48  ;;  %v179_v57 = vmax.f32 %v172_v51, 0.0 }
  0xe4   :  { %v175_v54 = vpop.f32.mrf.mxu0 }
  0xe5   :  { %v176_v55 = vadd.f32 %v175_v54, %v64_v47  ;;  %v180_v56 = vmax.f32 %v174_v52, 0.0 }
  0xe7   :  { %v181_v58 = vmax.f32 %v176_v55, 0.0  ;;  %v182_v61 = vpack.c.bf16 %v180_v56, %v178_v59 }
  0xe9   :  { %v183_v60 = vpack.c.bf16 %v181_v58, %v179_v57 }
  0xeb   :  { %351 = vmatprep.mubr.bf16.mxu1 %v183_v60 }
  0xec   :  { %352 = vmatmul.mubr.bf16.vlgmr.msra.gmra.mxu1 %v182_v61 }
  0xed   :  { %741 = vmatprep.mubr.msk.bf16.mxu1 %vm802_vm2, %v801_v36  ;;  %734 = vmatpush3.bf16.msra.mxu1 %v796_v2 }
  0xee   :  { %735 = vmatprep.subr.bf16.mxu1 %v801_v36 }
  0xf1   :  { %736 = vmatpush3.bf16.msra.mxu1 %v797_v15 }
  0xf2   :  { %737 = vmatprep.subr.bf16.mxu1 %v801_v36 }
  0xf5   :  { %738 = vmatpush3.bf16.msra.mxu1 %v798_v16 }
  0xf6   :  { %739 = vmatprep.subr.bf16.mxu1 %v801_v36 }
  0xf9   :  { %740 = vmatpush3.bf16.msra.mxu1 %v799_v17 }
  0xfa   :  { %745 = vmatprep.subr.bf16.mxu1 %v801_v36 }
 0x1ac   :  { %v691_v3 = vpop.f32.mrf.mxu1 }
 0x1ae   :  { %v692_v4 = vpop.f32.mrf.mxu1 }
 0x1af   :  { %v693_v5 = vadd.f32 %v692_v4, %v691_v3 }
 0x1b0   :  { %v694_v7 = vpop.f32.mrf.mxu1 }
 0x1b1   :  { %v354_v9 = vadd.f32 %v693_v5, %v642_v6 }
 0x1b2   :  { %v695_v8 = vpop.f32.mrf.mxu1 }
 0x1b3   :  { %v696_v10 = vadd.f32 %v695_v8, %v694_v7  ;;  %v360_v12 = vmax.f32 %v354_v9, 0.0 }
 0x1b5   :  { %v357_v11 = vadd.f32 %v696_v10, %v642_v6 }
 0x1b7   :  { %v361_v13 = vmax.f32 %v357_v11, 0.0 }
 0x1b9   :  { %v362_v14 = vpack.c.bf16 %v361_v13, %v360_v12 }
 0x1bb   :  { %730 = vmatmul.mubr.bf16.vlgmr.msra.gmra.mxu0 %v362_v14 }
 0x27b   :  { %v468_v19 = vpop.f32.mrf.mxu0 }
 0x27c   :  { %v469_v21 = vadd.f32 %v659_v18, %v468_v19 }
 0x27d   :  { %v731_v20 = vpop.f32.mrf.mxu0 }
 0x27e   :  { %v475_v25 = vmax.f32 %v469_v21, 0.0 }
 0x27f   :  { %v471_v22 = vpop.f32.mrf.mxu0 }
 0x280   :  { %v472_v23 = vadd.f32 %v659_v18, %v471_v22 }
 0x281   :  { %v732_v24 = vpop.f32.mrf.mxu0 }
 0x282   :  { %v476_v26 = vmax.f32 %v472_v23, 0.0 }
 0x284   :  { %v477_v27 = vpack.c.bf16 %v476_v26, %v475_v25 }
 0x286   :  { %742 = vmatmul.mubr.msk.bf16.vlgmr.msra.gmra.mxu1 %vm517_vm3, %v477_v27 }
 0x287   :  { %747 = vmatprep.mubr.msk.bf16.mxu1 %vm802_vm2, %v801_v36 }
 0x346   :  { %v555_v31 = vpop.f32.mrf.mxu1 }
 0x347   :  { %v556_v33 = vadd.f32 %v668_v30, %v555_v31 }
 0x348   :  { %v743_v32 = vpop.f32.mrf.mxu1 }
 0x349   :  { %v562_v38 = vmax.f32 %v556_v33, 0.0 }
 0x34a   :  { %v558_v34 = vpop.f32.mrf.mxu1 }
 0x34b   :  { %v559_v35 = vadd.f32 %v668_v30, %v558_v34 }
 0x34c   :  { %v744_v37 = vpop.f32.mrf.mxu1 }
 0x34d   :  { %v563_v39 = vmax.f32 %v559_v35, 0.0 }
 0x34f   :  { %v564_v36 = vpack.c.bf16 %v563_v39, %v562_v38 }
 0x351   :  { %v581_v40 = vsel %vm576_vm4, %v564_v36, 0 }
 0x352   :  { %746 = vmatpush3.bf16.xpose.msra.mxu1 %v581_v40 }
 0x359   :  { %748 = vmatmul.mubr.msk.bf16.vlgmr.msra.gmra.mxu1 %vm576_vm4, %v565_v41 }
 0x419   :  { %v617_v46 = vpop.f32.mrf.mxu1 }
 0x41a   :  { %v618_v47 = vadd.f32 %v617_v46, %v575_v45 }
 0x41b   :  { %v749_v48 = vpop.f32.mrf.mxu1 }
 0x41c   :  { %624 = vst.msk [vmem:[%s1045_s11] sm:$0x1] %vm623_vm5, %v618_v47 }
 0x41d   :  { %v620_v49 = vpop.f32.mrf.mxu1 }
 0x41f   :  { %v750_v50 = vpop.f32.mrf.mxu1 }

</bundles_post_ra>
